<compile_context>
chip_gen: v5e
topology: v5e:2x2
jax: 0.10.0
libtpu: 0.0.40
codegen_flags: <defaults>
</compile_context>

<pallas_src>
import functools

import jax
import jax.numpy as jnp
from jax import lax
from jax.experimental import pallas as pl
from jax.experimental.pallas import tpu as pltpu

UNIFORM_RANGE = 0.3
_GOLDEN = 0x9E3779B9  # seed mixing constant


def _hash_u32(x):
    # "lowbias32" integer mixer — fixed shifts, cheap on the VPU.
    x = x ^ (x >> jnp.uint32(16))
    x = x * jnp.uint32(0x7FEB352D)
    x = x ^ (x >> jnp.uint32(15))
    x = x * jnp.uint32(0x846CA68B)
    x = x ^ (x >> jnp.uint32(16))
    return x


def _feature_noise_kernel(seed_ref, x_ref, o_ref, *, rows_per_tile, lanes,
                          uniform_range):
    seed = seed_ref[0].astype(jnp.uint32)
    tile = pl.program_id(0)

    # Global feature index of element (b, r, l) is (row0 + r) * lanes + l:
    # independent of the batch coordinate, of the tiling and of which core
    # runs the tile, so the noise row is shared across the whole batch.
    row_ids = tile * rows_per_tile + lax.broadcasted_iota(
        jnp.int32, (1, rows_per_tile, lanes), 1)
    lane_ids = lax.broadcasted_iota(jnp.int32, (1, rows_per_tile, lanes), 2)
    j = (row_ids * lanes + lane_ids).astype(jnp.uint32)

    h = _hash_u32(j + seed * jnp.uint32(_GOLDEN))
    h = _hash_u32(h ^ seed)

    # Exponent bit-trick: top 23 bits as mantissa -> float32 uniform in [1, 2).
    fbits = (h >> jnp.uint32(9)) | jnp.uint32(0x3F800000)
    u12 = lax.bitcast_convert_type(fbits, jnp.float32)

    # noise = (u12 - 1) * 2r - r  in [-r, r);  out = x * (1 + noise)
    #      => scale = u12 * 2r + (1 - 3r)   (single fused f32 affine per lane)
    scale = u12 * jnp.float32(2.0 * uniform_range) + jnp.float32(
        1.0 - 3.0 * uniform_range)

    # Multiply in f32; cast only at the final store.
    o_ref[...] = (x_ref[...].astype(jnp.float32) * scale).astype(o_ref.dtype)


def feature_noise(x_nchw, seed, uniform_range=UNIFORM_RANGE,
                  target_block_bytes=2 << 20):
    """Applies FeatureNoise to an NCHW tensor via a Pallas TPU kernel."""
    n, c, h, w = x_nchw.shape
    f = c * h * w
    dtype_bytes = jnp.dtype(x_nchw.dtype).itemsize

    # Lane width: largest multiple of 128 dividing F that still leaves >= 8
    # sublane rows (full (8,128) granules); pad only in the rare case where F
    # is not a multiple of 128.
    lanes = 0
    for cand in (1024, 512, 256, 128):
        if f % cand == 0 and (f >= 8 * cand or cand == 128):
            lanes = cand
            break
    if lanes:
        f_pad = f
    else:
        lanes = 128
        f_pad = 128 * pl.cdiv(f, 128)

    x2 = x_nchw.reshape(n, f)
    if f_pad != f:
        x2 = jnp.pad(x2, ((0, 0), (0, f_pad - f)))  # rare: F % 128 != 0
    rows = f_pad // lanes
    x3 = x2.reshape(n, rows, lanes)

    # Rows per tile: multiple of 8, sized toward ~target_block_bytes so the
    # per-grid-step overhead is amortized and DMAs move large contiguous
    # slabs.  2 arrays x 2 double-buffers x block fits v5e/v6e/v7x scoped VMEM
    # defaults with plenty of headroom (no vmem_limit override needed).
    rows_target = max(1, target_block_bytes // (n * lanes * dtype_bytes))
    if rows_target >= rows or rows <= 8:
        rpt = rows                      # whole array in one block
    else:
        rpt = min(rows, max(8, (rows_target // 8) * 8))
    grid = pl.cdiv(rows, rpt)           # ragged last block: OOB writes masked

    seed_arr = jnp.asarray([seed], dtype=jnp.int32)
    kernel = functools.partial(
        _feature_noise_kernel, rows_per_tile=rpt, lanes=lanes,
        uniform_range=float(uniform_range))

    out = pl.pallas_call(
        kernel,
        out_shape=jax.ShapeDtypeStruct((n, rows, lanes), x3.dtype),
        grid_spec=pltpu.PrefetchScalarGridSpec(
            num_scalar_prefetch=1,  # seed lands in SMEM
            grid=(grid,),
            in_specs=[pl.BlockSpec((n, rpt, lanes), lambda i, s_ref: (0, i, 0))],
            out_specs=pl.BlockSpec((n, rpt, lanes), lambda i, s_ref: (0, i, 0)),
        ),
        compiler_params=pltpu.CompilerParams(
            # Row tiles are fully independent.
            # TODO(synk): use pltpu.CORE_PARALLEL when targeting v7x (2 TCs).
            dimension_semantics=("parallel",),
        ),
        cost_estimate=pl.CostEstimate(
            flops=2 * n * f,
            transcendentals=0,
            bytes_accessed=2 * n * f * dtype_bytes,
        ),
    )(seed_arr, x3)

    out = out.reshape(n, f_pad)
    if f_pad != f:
        out = out[:, :f]
    return out.reshape(n, c, h, w)


if __name__ == "__main__":
    key = jax.random.PRNGKey(0)
    x = jax.random.normal(key, (2, 4, 16, 16), dtype=jnp.float32)

    out = feature_noise(x, seed=0)
    out = jax.block_until_ready(out)

    # Sanity checks on the semantics:
    assert out.shape == x.shape and out.dtype == x.dtype
    # out = x * (1 + noise) with noise in [-0.3, 0.3) => ratio in [0.7, 1.3)
    ratio = out / jnp.where(jnp.abs(x) > 1e-6, x, 1.0)
    ratio = jnp.where(jnp.abs(x) > 1e-6, ratio, 1.0)
    assert bool(jnp.all(ratio > 1.0 - UNIFORM_RANGE - 1e-5))
    assert bool(jnp.all(ratio < 1.0 + UNIFORM_RANGE + 1e-5))
    # Noise is shared across the batch dimension: per-element ratio equal for
    # batch 0 and batch 1 wherever x is well-conditioned.
    mask = jnp.min(jnp.abs(x), axis=0) > 1e-3
    assert bool(jnp.all(jnp.where(mask, jnp.abs(ratio[0] - ratio[1]) < 1e-4, True)))
    # Determinism: same seed -> identical output.
    out2 = jax.block_until_ready(feature_noise(x, seed=0))
    assert bool(jnp.all(out == out2))

    print("KERNEL_OK")
</pallas_src>

<mosaic_0001>
module attributes {stable_mosaic.version = 11 : i64} {
  func.func @_feature_noise_kernel(%arg0: i32, %arg1: memref<1xi32, #tpu.memory_space<smem>>, %arg2: memref<2x8x128xf32, #tpu.memory_space<vmem>>, %arg3: memref<2x8x128xf32, #tpu.memory_space<vmem>>) attributes {dimension_semantics = [#tpu.dimension_semantics<parallel>], iteration_bounds = array<i64: 1>, scalar_prefetch = 1 : i64, scratch_operands = 0 : i64, tpu.core_type = #tpu.core_type<tc>, window_params = [{transform_indices = @transform_0, window_bounds = array<i64: 2, 8, 128>}, {transform_indices = @transform_1, window_bounds = array<i64: 2, 8, 128>}]} {
    %c0 = arith.constant 0 : index
    %0 = memref.load %arg1[%c0] : memref<1xi32, #tpu.memory_space<smem>>
    %c8_i32 = arith.constant 8 : i32
    %1 = arith.muli %arg0, %c8_i32 : i32
    %2 = tpu.iota {dimensions = array<i32: 1>} : vector<1x8x128xi32>
    %3 = vector.broadcast %1 : i32 to vector<1x8x128xi32>
    %4 = arith.addi %3, %2 : vector<1x8x128xi32>
    %5 = tpu.iota {dimensions = array<i32: 2>} : vector<1x8x128xi32>
    %c128_i32 = arith.constant 128 : i32
    %6 = vector.broadcast %c128_i32 : i32 to vector<1x8x128xi32>
    %7 = arith.muli %4, %6 : vector<1x8x128xi32>
    %8 = arith.addi %7, %5 : vector<1x8x128xi32>
    %c-1640531527_i32 = arith.constant -1640531527 : i32
    %9 = arith.muli %0, %c-1640531527_i32 : i32
    %10 = vector.broadcast %9 : i32 to vector<1x8x128xi32>
    %11 = arith.addi %8, %10 : vector<1x8x128xi32>
    %c16_i32 = arith.constant 16 : i32
    %12 = vector.broadcast %c16_i32 : i32 to vector<1x8x128xi32>
    %13 = arith.shrui %11, %12 : vector<1x8x128xi32>
    %14 = arith.xori %11, %13 : vector<1x8x128xi32>
    %c2146121005_i32 = arith.constant 2146121005 : i32
    %15 = vector.broadcast %c2146121005_i32 : i32 to vector<1x8x128xi32>
    %16 = arith.muli %14, %15 : vector<1x8x128xi32>
    %c15_i32 = arith.constant 15 : i32
    %17 = vector.broadcast %c15_i32 : i32 to vector<1x8x128xi32>
    %18 = arith.shrui %16, %17 : vector<1x8x128xi32>
    %19 = arith.xori %16, %18 : vector<1x8x128xi32>
    %c-2073254261_i32 = arith.constant -2073254261 : i32
    %20 = vector.broadcast %c-2073254261_i32 : i32 to vector<1x8x128xi32>
    %21 = arith.muli %19, %20 : vector<1x8x128xi32>
    %c16_i32_0 = arith.constant 16 : i32
    %22 = vector.broadcast %c16_i32_0 : i32 to vector<1x8x128xi32>
    %23 = arith.shrui %21, %22 : vector<1x8x128xi32>
    %24 = arith.xori %21, %23 : vector<1x8x128xi32>
    %25 = vector.broadcast %0 : i32 to vector<1x8x128xi32>
    %26 = arith.xori %24, %25 : vector<1x8x128xi32>
    %c16_i32_1 = arith.constant 16 : i32
    %27 = vector.broadcast %c16_i32_1 : i32 to vector<1x8x128xi32>
    %28 = arith.shrui %26, %27 : vector<1x8x128xi32>
    %29 = arith.xori %26, %28 : vector<1x8x128xi32>
    %c2146121005_i32_2 = arith.constant 2146121005 : i32
    %30 = vector.broadcast %c2146121005_i32_2 : i32 to vector<1x8x128xi32>
    %31 = arith.muli %29, %30 : vector<1x8x128xi32>
    %c15_i32_3 = arith.constant 15 : i32
    %32 = vector.broadcast %c15_i32_3 : i32 to vector<1x8x128xi32>
    %33 = arith.shrui %31, %32 : vector<1x8x128xi32>
    %34 = arith.xori %31, %33 : vector<1x8x128xi32>
    %c-2073254261_i32_4 = arith.constant -2073254261 : i32
    %35 = vector.broadcast %c-2073254261_i32_4 : i32 to vector<1x8x128xi32>
    %36 = arith.muli %34, %35 : vector<1x8x128xi32>
    %c16_i32_5 = arith.constant 16 : i32
    %37 = vector.broadcast %c16_i32_5 : i32 to vector<1x8x128xi32>
    %38 = arith.shrui %36, %37 : vector<1x8x128xi32>
    %39 = arith.xori %36, %38 : vector<1x8x128xi32>
    %c9_i32 = arith.constant 9 : i32
    %40 = vector.broadcast %c9_i32 : i32 to vector<1x8x128xi32>
    %41 = arith.shrui %39, %40 : vector<1x8x128xi32>
    %c1065353216_i32 = arith.constant 1065353216 : i32
    %42 = vector.broadcast %c1065353216_i32 : i32 to vector<1x8x128xi32>
    %43 = arith.ori %41, %42 : vector<1x8x128xi32>
    %44 = tpu.bitcast %43 : vector<1x8x128xi32> -> vector<1x8x128xf32>
    %cst = arith.constant 6.000000e-01 : f32
    %45 = vector.broadcast %cst : f32 to vector<1x8x128xf32>
    %46 = arith.mulf %44, %45 : vector<1x8x128xf32>
    %cst_6 = arith.constant 1.000000e-01 : f32
    %47 = vector.broadcast %cst_6 : f32 to vector<1x8x128xf32>
    %48 = arith.addf %46, %47 : vector<1x8x128xf32>
    %c0_7 = arith.constant 0 : index
    %c0_8 = arith.constant 0 : index
    %c0_9 = arith.constant 0 : index
    %49 = vector.load %arg2[%c0_7, %c0_8, %c0_9] : memref<2x8x128xf32, #tpu.memory_space<vmem>>, vector<2x8x128xf32>
    %50 = vector.broadcast %48 : vector<1x8x128xf32> to vector<2x8x128xf32>
    %51 = arith.mulf %49, %50 : vector<2x8x128xf32>
    %c0_10 = arith.constant 0 : index
    %c0_11 = arith.constant 0 : index
    %c0_12 = arith.constant 0 : index
    %52 = vector.load %arg3[%c0_10, %c0_11, %c0_12] : memref<2x8x128xf32, #tpu.memory_space<vmem>>, vector<2x8x128xf32>
    tpu.vector_store %arg3[%c0_10, %c0_11, %c0_12], %51 {strides = array<i32>} : memref<2x8x128xf32, #tpu.memory_space<vmem>>, vector<2x8x128xf32>,
    return
  }
  func.func @transform_0(%arg0: i32, %arg1: memref<1xi32, #tpu.memory_space<smem>>) -> (i32, i32, i32) {
    %c0_i32 = arith.constant 0 : i32
    %c0_i32_0 = arith.constant 0 : i32
    %c0_i32_1 = arith.constant 0 : i32
    return %c0_i32, %arg0, %c0_i32_0 : i32, i32, i32
  }
  func.func @transform_1(%arg0: i32, %arg1: memref<1xi32, #tpu.memory_space<smem>>) -> (i32, i32, i32) {
    %c0_i32 = arith.constant 0 : i32
    %c0_i32_0 = arith.constant 0 : i32
    %c0_i32_1 = arith.constant 0 : i32
    return %c0_i32, %arg0, %c0_i32_0 : i32, i32, i32
  }
}

</mosaic_0001>

<bundles_post_ra>
// kernel: tpu_custom_call.1
= control target key start
LH: loop header
LB: loop body
LE: loop exit
PB: predicated region body
PF: predicated region fallthrough
CT: control target
= control target key end

     0   :  { %8 = vsyncpa [#allocation5], 0  ;;  %s181_s0 = inlined_call_operand.<no memory space> [shape: s32[1], index: 0, kind: input, shape index: {}]   ;;  %s182_s1 = inlined_call_operand.hbm [shape: f32[2,8,128], index: 1, kind: input, shape index: {}]   ;;  %s183_s2 = inlined_call_operand.hbm [shape: f32[2,8,128], index: 2, kind: output, shape index: {}]  }
   0x1   :  { %9 = vsyncpa [#allocation6], 0  ;;  %s14_s11 = sshll.u32 %s182_s1, 4  ;;  %s144_s12 = smov [#allocation4]   ;;  %s15_s11 = int_to_ptr.hbm [resolvable:$true] %s14_s11 }
   0x2   :  { %s16_s13 = sshll.u32 %s144_s12, 4  ;;  %s145_s14 = smov 128   ;;  %s17_s13 = int_to_ptr.vmem [resolvable:$true] %s16_s13 }
   0x3   :  { %s146_s15 = smov 8  }
   0x4   :  { %22 = dma.hbm_to_vmem [thread:$0]  %s15_s11, 256, %s17_s13, [#allocation5], %s145_s14, %s145_s14, %s146_s15  }
   0x5   :  { %140 = dma.done.wait [#allocation5], 256  }
   0x6   :  { %141 = vsyncadd [#allocation5], 4294967040  ;;  %v29_v0 = vlaneseq  ;;  %s37_s18 = smul.u32 2654435769, %s181_s0  ;;  %v48_v14 = vstv %s181_s0  ;;  %v63_v28 = vld [vmem:[#allocation4] sm:$0xff]  ;;  %v64_v29 = vld [vmem:[#allocation4 + $0x8] sm:$0xff] }
   0x7   :  { %s147_s20 = smov [#allocation7]   ;;  %s75_s23 = sshll.u32 %s183_s2, 4  ;;  %s76_s23 = int_to_ptr.hbm [resolvable:$true] %s75_s23 }
   0x8   :  { %v30_v1 = vshrl.u32 %v29_v0, 7  ;;  %v34_v2 = vand.u32 127, %v29_v0  ;;  %v38_v4 = vstv %s37_s18  ;;  %s73_s21 = sshll.u32 %s147_s20, 4  ;;  %s74_s21 = int_to_ptr.vmem [resolvable:$true] %s73_s21 }
   0xa   :  { %v35_v3 = vmul.u32 128, %v30_v1 }
   0xc   :  { %v36_v5 = vadd.s32 %v35_v3, %v34_v2 }
   0xe   :  { %v39_v6 = vadd.s32 %v38_v4, %v36_v5 }
  0x10   :  { %v40_v7 = vshrl.u32 %v39_v6, 16 }
  0x12   :  { %v41_v8 = vxor.u32 %v40_v7, %v39_v6 }
  0x14   :  { %v42_v9 = vmul.u32 2146121005, %v41_v8 }
  0x16   :  { %v43_v10 = vshrl.u32 %v42_v9, 15 }
  0x18   :  { %v44_v11 = vxor.u32 %v43_v10, %v42_v9 }
  0x1a   :  { %v45_v12 = vmul.u32 2221713035, %v44_v11 }
  0x1c   :  { %v46_v13 = vshrl.u32 %v45_v12, 16 }
  0x1e   :  { %v47_v15 = vxor.u32 %v46_v13, %v45_v12 }
  0x20   :  { %v49_v16 = vxor.u32 %v48_v14, %v47_v15 }
  0x22   :  { %v50_v17 = vshrl.u32 %v49_v16, 16 }
  0x24   :  { %v51_v18 = vxor.u32 %v50_v17, %v49_v16 }
  0x26   :  { %v52_v19 = vmul.u32 2146121005, %v51_v18 }
  0x28   :  { %v53_v20 = vshrl.u32 %v52_v19, 15 }
  0x2a   :  { %v54_v21 = vxor.u32 %v53_v20, %v52_v19 }
  0x2c   :  { %v55_v22 = vmul.u32 2221713035, %v54_v21 }
  0x2e   :  { %v56_v23 = vshrl.u32 %v55_v22, 16 }
  0x30   :  { %v57_v24 = vxor.u32 %v56_v23, %v55_v22 }
  0x32   :  { %v58_v25 = vshrl.u32 %v57_v24, 9 }
  0x34   :  { %v59_v26 = vor.u32 1065353216, %v58_v25 }
  0x36   :  { %v61_v27 = vmul.f32 0.6, %v59_v26 }
  0x38   :  { %v62_v30 = vadd.f32 0.1, %v61_v27 }
  0x3a   :  { %v65_v31 = vmul.f32 %v63_v28, %v62_v30  ;;  %v66_v32 = vmul.f32 %v64_v29, %v62_v30 }
  0x3c   :  { %67 = vst [vmem:[#allocation7] sm:$0xff] %v65_v31 }
  0x3d   :  { %68 = vst [vmem:[#allocation7 + $0x8] sm:$0xff] %v66_v32 }
  0x3e   :  { %81 = dma.vmem_to_hbm [thread:$0]  %s74_s21, 256, %s76_s23, [#allocation6], %s145_s14, %s145_s14, %s146_s15  }
  0x3f   :  { %142 = dma.done.wait [#allocation6], 256  }
  0x40   :  { %143 = vsyncadd [#allocation6], 4294967040 }
  0x41   :  { %86 = vsyncpa [#allocation5], 1 }
  0x42   :  { %87 = vsyncpa [#allocation6], 1 }

</bundles_post_ra>
